<compile_context>
chip_gen: v7x
topology: tpu7x:2x2x1
jax: 0.10.0
libtpu: 0.0.40
codegen_flags: <defaults>
</compile_context>

<pallas_src>
import functools

import jax
import jax.numpy as jnp
from jax.experimental import pallas as pl
from jax.experimental.pallas import tpu as pltpu

_LANES = 128
_SUBLANE_MULT = 32          # sublane multiple so int8 targets tile natively


def _focal_loss_kernel(x_ref, t_ref, out_ref, *,
                       gamma, eps, alpha_spam, alpha_ham,
                       tile_r, last_valid):
    # x_ref: (2, tile_r, 128) logits slab (class-0 plane, class-1 plane)
    # t_ref: (tile_r, 128) int8 targets in {0,1} (padding masked in last block)
    x = x_ref[...].astype(jnp.float32)
    x0 = x[0]
    x1 = x[1]
    t = t_ref[...].astype(jnp.float32)

    # --- C=2 specialized log-sum-exp (log_softmax denominator) ---
    d = x0 - x1
    mx = jnp.maximum(x0, x1)
    lse = mx + jnp.log(1.0 + jnp.exp(-jnp.abs(d)))

    # --- label-smoothed cross entropy (reduction='none') ---
    # q_target = (1-eps)+eps/2, q_other = eps/2  =>
    # ce = lse - (1-eps)*x_t - (eps/2)*(x0+x1)
    x_t = x0 + t * (x1 - x0)                      # logit of the target class
    ce = lse - (1.0 - eps) * x_t - (eps * 0.5) * (x0 + x1)

    # --- focal term: (1 - pt)^gamma, pt = exp(-ce) ---
    pt = jnp.exp(-ce)
    u = jnp.maximum(1.0 - pt, 0.0)                # clamp: avoid pow/NaN hazard
    g_int = int(gamma)
    if float(gamma) == float(g_int) and g_int >= 1:
        focal = u
        for _ in range(g_int - 1):                # gamma=3 -> u*u*u (VPU only)
            focal = focal * u
    elif float(gamma) == 0.0:
        focal = jnp.ones_like(u)
    else:
        focal = u ** gamma

    # --- alpha factor: alpha[targets] as a lerp on t (constants baked in) ---
    alpha_f = alpha_spam + (alpha_ham - alpha_spam) * t

    loss = alpha_f * focal * ce                   # (tile_r, 128)

    last = pl.num_programs(0) - 1

    @pl.when(pl.program_id(0) != last)
    def _():
        # Steady state: no masking work; aligned (8,128) partial-sum store.
        out_ref[...] = loss.reshape(tile_r // 8, 8, _LANES).sum(axis=0)

    @pl.when(pl.program_id(0) == last)
    def _():
        # Only the final block can contain padded tail elements; mask them.
        row = jax.lax.broadcasted_iota(jnp.int32, (tile_r, _LANES), 0)
        col = jax.lax.broadcasted_iota(jnp.int32, (tile_r, _LANES), 1)
        flat = row * _LANES + col                 # block-local flat index
        masked = jnp.where(flat < last_valid, loss, 0.0)
        out_ref[...] = masked.reshape(tile_r // 8, 8, _LANES).sum(axis=0)


def _round_up(v, m):
    return -(-v // m) * m


def focal_loss(logits, targets, alpha_spam=0.2, alpha_ham=0.8, gamma=3.0,
               label_smoothing=0.1, reduction="mean", tile_rows=2048):
    """logits: (N, 2) float, targets: (N,) int in {0,1}. Returns scalar loss."""
    n, c = logits.shape
    assert c == 2, "FocalLoss kernel is specialized for binary (spam/ham) logits"

    # ---- tile sizing ----
    r = -(-n // _LANES)                                   # rows of 128 elements
    tile_r = _round_up(min(int(tile_rows), max(r, 1)), _SUBLANE_MULT)
    if r >= 2 * _SUBLANE_MULT:
        # Cap so num_blocks >= 2: lets the "parallel" axis shard across both
        # v7x TensorCores instead of collapsing to a single grid block.
        tile_r = min(tile_r, _round_up(-(-r // 2), _SUBLANE_MULT))
    tile_r = max(_SUBLANE_MULT, tile_r)
    r_pad = _round_up(r, tile_r)
    num_blocks = r_pad // tile_r
    pad = r_pad * _LANES - n

    # ---- lane-dense slabs (layout plumbing; fusible into the pallas_call) ----
    # Logits kept in their incoming dtype (bf16 passthrough); targets as int8.
    x = jnp.pad(jnp.transpose(logits), ((0, 0), (0, pad))).reshape(2, r_pad, _LANES)
    t8 = jnp.pad(targets.astype(jnp.int8), (0, pad)).reshape(r_pad, _LANES)

    # Valid elements inside the last block (everything before it is full).
    last_valid = n - (num_blocks - 1) * tile_r * _LANES

    kernel = functools.partial(
        _focal_loss_kernel,
        gamma=gamma, eps=label_smoothing,
        alpha_spam=float(alpha_spam), alpha_ham=float(alpha_ham),
        tile_r=tile_r, last_valid=last_valid)

    partial_sums = pl.pallas_call(
        kernel,
        out_shape=jax.ShapeDtypeStruct((num_blocks * 8, _LANES), jnp.float32),
        grid=(num_blocks,),
        in_specs=[
            pl.BlockSpec((2, tile_r, _LANES), lambda i: (0, i, 0)),   # logits slab
            pl.BlockSpec((tile_r, _LANES), lambda i: (i, 0)),         # int8 targets
        ],
        out_specs=pl.BlockSpec((8, _LANES), lambda i: (i, 0)),
        compiler_params=pltpu.CompilerParams(
            dimension_semantics=("parallel",),
            allow_input_fusion=[True, True],
            vmem_limit_bytes=32 * 1024 * 1024),
    )(x, t8)

    total = jnp.sum(partial_sums)
    if reduction == "mean":
        return total / jnp.float32(n)
    elif reduction == "sum":
        return total
    # TODO(synk): reduction='none' (per-element loss output) not implemented;
    # the grid/out_spec only materializes lane-dense partial sums.
    raise NotImplementedError("reduction must be 'mean' or 'sum'")


def _reference_focal_loss(logits, targets, alpha_spam=0.2, alpha_ham=0.8,
                          gamma=3.0, label_smoothing=0.1):
    """Plain-JAX reference mirroring the PyTorch forward (reduction='mean')."""
    x = logits.astype(jnp.float32)
    n, c = x.shape
    logp = jax.nn.log_softmax(x, axis=-1)
    onehot = jax.nn.one_hot(targets, c, dtype=jnp.float32)
    q = (1.0 - label_smoothing) * onehot + label_smoothing / c
    ce = -jnp.sum(q * logp, axis=-1)
    pt = jnp.exp(-ce)
    focal = (1.0 - pt) ** gamma
    alpha = jnp.array([alpha_spam, alpha_ham], dtype=jnp.float32)
    alpha_factor = alpha[targets]
    return jnp.mean(alpha_factor * focal * ce)


if __name__ == "__main__":
    key = jax.random.PRNGKey(0)
    k1, k2, k3, k4 = jax.random.split(key, 4)

    # Case 1: small, non-multiple-of-128 N (exercises last-block tail masking,
    # single grid block).
    N1, C = 1000, 2
    logits1 = jax.random.normal(k1, (N1, C), dtype=jnp.float32) * 2.0
    targets1 = jax.random.randint(k2, (N1,), 0, C, dtype=jnp.int32)
    out1 = jax.block_until_ready(focal_loss(logits1, targets1))
    ref1 = _reference_focal_loss(logits1, targets1)
    assert jnp.allclose(out1, ref1, atol=1e-5, rtol=1e-5), (out1, ref1)

    # Case 2: multi-block grid (exercises the unmasked steady-state branch and
    # the >=2-blocks-for-megacore tiling path).
    N2 = 25600
    logits2 = jax.random.normal(k3, (N2, C), dtype=jnp.float32) * 2.0
    targets2 = jax.random.randint(k4, (N2,), 0, C, dtype=jnp.int32)
    out2 = jax.block_until_ready(focal_loss(logits2, targets2))
    ref2 = _reference_focal_loss(logits2, targets2)
    assert jnp.allclose(out2, ref2, atol=1e-5, rtol=1e-5), (out2, ref2)

    print("KERNEL_OK")
</pallas_src>

<mosaic_0001>
module attributes {stable_mosaic.version = 11 : i64} {
  func.func @_focal_loss_kernel(%arg0: i32, %arg1: memref<2x32x128xf32, #tpu.memory_space<vmem>>, %arg2: memref<32x128xi8, #tpu.memory_space<vmem>>, %arg3: memref<8x128xf32, #tpu.memory_space<vmem>>) attributes {dimension_semantics = [#tpu.dimension_semantics<parallel>], iteration_bounds = array<i64: 1>, scalar_prefetch = 0 : i64, scratch_operands = 0 : i64, tpu.core_type = #tpu.core_type<tc>, window_params = [{transform_indices = @transform_0, window_bounds = array<i64: 2, 32, 128>}, {transform_indices = @transform_1, window_bounds = array<i64: 32, 128>}, {transform_indices = @transform_2, window_bounds = array<i64: 8, 128>}]} {
    %c0 = arith.constant 0 : index
    %c0_0 = arith.constant 0 : index
    %c0_1 = arith.constant 0 : index
    %0 = vector.load %arg1[%c0, %c0_0, %c0_1] : memref<2x32x128xf32, #tpu.memory_space<vmem>>, vector<2x32x128xf32>
    %1 = vector.extract_strided_slice %0 {offsets = [0, 0, 0], sizes = [1, 32, 128], strides = [1, 1, 1]} : vector<2x32x128xf32> to vector<1x32x128xf32>
    %2 = vector.shape_cast %1 : vector<1x32x128xf32> to vector<32x128xf32>
    %3 = vector.extract_strided_slice %0 {offsets = [1, 0, 0], sizes = [1, 32, 128], strides = [1, 1, 1]} : vector<2x32x128xf32> to vector<1x32x128xf32>
    %4 = vector.shape_cast %3 : vector<1x32x128xf32> to vector<32x128xf32>
    %c0_2 = arith.constant 0 : index
    %c0_3 = arith.constant 0 : index
    %5 = vector.load %arg2[%c0_2, %c0_3] : memref<32x128xi8, #tpu.memory_space<vmem>>, vector<32x128xi8>
    %6 = arith.sitofp %5 : vector<32x128xi8> to vector<32x128xf32>
    %7 = arith.subf %2, %4 : vector<32x128xf32>
    %8 = arith.maximumf %2, %4 : vector<32x128xf32>
    %9 = math.absf %7 : vector<32x128xf32>
    %cst = arith.constant 0.000000e+00 : f32
    %10 = vector.broadcast %cst : f32 to vector<32x128xf32>
    %11 = arith.subf %10, %9 : vector<32x128xf32>
    %12 = math.exp %11 : vector<32x128xf32>
    %cst_4 = arith.constant 1.000000e+00 : f32
    %13 = vector.broadcast %cst_4 : f32 to vector<32x128xf32>
    %14 = arith.addf %13, %12 : vector<32x128xf32>
    %15 = math.log %14 : vector<32x128xf32>
    %16 = arith.addf %8, %15 : vector<32x128xf32>
    %17 = arith.subf %4, %2 : vector<32x128xf32>
    %18 = arith.mulf %6, %17 : vector<32x128xf32>
    %19 = arith.addf %2, %18 : vector<32x128xf32>
    %cst_5 = arith.constant 0.899999976 : f32
    %20 = vector.broadcast %cst_5 : f32 to vector<32x128xf32>
    %21 = arith.mulf %20, %19 : vector<32x128xf32>
    %22 = arith.subf %16, %21 : vector<32x128xf32>
    %23 = arith.addf %2, %4 : vector<32x128xf32>
    %cst_6 = arith.constant 5.000000e-02 : f32
    %24 = vector.broadcast %cst_6 : f32 to vector<32x128xf32>
    %25 = arith.mulf %24, %23 : vector<32x128xf32>
    %26 = arith.subf %22, %25 : vector<32x128xf32>
    %cst_7 = arith.constant 0.000000e+00 : f32
    %27 = vector.broadcast %cst_7 : f32 to vector<32x128xf32>
    %28 = arith.subf %27, %26 : vector<32x128xf32>
    %29 = math.exp %28 : vector<32x128xf32>
    %cst_8 = arith.constant 1.000000e+00 : f32
    %30 = vector.broadcast %cst_8 : f32 to vector<32x128xf32>
    %31 = arith.subf %30, %29 : vector<32x128xf32>
    %cst_9 = arith.constant 0.000000e+00 : f32
    %32 = vector.broadcast %cst_9 : f32 to vector<32x128xf32>
    %33 = arith.maximumf %31, %32 : vector<32x128xf32>
    %34 = arith.mulf %33, %33 : vector<32x128xf32>
    %35 = arith.mulf %34, %33 : vector<32x128xf32>
    %cst_10 = arith.constant 6.000000e-01 : f32
    %36 = vector.broadcast %cst_10 : f32 to vector<32x128xf32>
    %37 = arith.mulf %36, %6 : vector<32x128xf32>
    %cst_11 = arith.constant 2.000000e-01 : f32
    %38 = vector.broadcast %cst_11 : f32 to vector<32x128xf32>
    %39 = arith.addf %38, %37 : vector<32x128xf32>
    %40 = arith.mulf %39, %35 : vector<32x128xf32>
    %41 = arith.mulf %40, %26 : vector<32x128xf32>
    %c0_i32 = arith.constant 0 : i32
    %42 = arith.cmpi ne, %arg0, %c0_i32 : i32
    %43 = arith.extui %42 : i1 to i32
    %c0_i32_12 = arith.constant 0 : i32
    %44 = arith.cmpi ne, %43, %c0_i32_12 : i32
    scf.if %44 {
      %48 = vector.shape_cast %41 : vector<32x128xf32> to vector<4x8x128xf32>
      %cst_15 = arith.constant dense<0.000000e+00> : vector<8x128xf32>
      %49 = vector.multi_reduction <add>, %48, %cst_15 [0] : vector<4x8x128xf32> to vector<8x128xf32>
      %c0_16 = arith.constant 0 : index
      %c0_17 = arith.constant 0 : index
      %50 = vector.load %arg3[%c0_16, %c0_17] : memref<8x128xf32, #tpu.memory_space<vmem>>, vector<8x128xf32>
      tpu.vector_store %arg3[%c0_16, %c0_17], %49 {strides = array<i32>} : memref<8x128xf32, #tpu.memory_space<vmem>>, vector<8x128xf32>,
    } else {
    }
    %c0_i32_13 = arith.constant 0 : i32
    %45 = arith.cmpi eq, %arg0, %c0_i32_13 : i32
    %46 = arith.extui %45 : i1 to i32
    %c0_i32_14 = arith.constant 0 : i32
    %47 = arith.cmpi ne, %46, %c0_i32_14 : i32
    scf.if %47 {
      %48 = tpu.iota {dimensions = array<i32: 0>} : vector<32x128xi32>
      %49 = tpu.iota {dimensions = array<i32: 1>} : vector<32x128xi32>
      %c128_i32 = arith.constant 128 : i32
      %50 = vector.broadcast %c128_i32 : i32 to vector<32x128xi32>
      %51 = arith.muli %48, %50 : vector<32x128xi32>
      %52 = arith.addi %51, %49 : vector<32x128xi32>
      %c1000_i32 = arith.constant 1000 : i32
      %53 = vector.broadcast %c1000_i32 : i32 to vector<32x128xi32>
      %54 = arith.cmpi slt, %52, %53 : vector<32x128xi32>
      %cst_15 = arith.constant 0.000000e+00 : f32
      %55 = vector.broadcast %cst_15 : f32 to vector<32x128xf32>
      %56 = arith.select %54, %41, %55 : vector<32x128xi1>, vector<32x128xf32>
      %57 = vector.shape_cast %56 : vector<32x128xf32> to vector<4x8x128xf32>
      %cst_16 = arith.constant dense<0.000000e+00> : vector<8x128xf32>
      %58 = vector.multi_reduction <add>, %57, %cst_16 [0] : vector<4x8x128xf32> to vector<8x128xf32>
      %c0_17 = arith.constant 0 : index
      %c0_18 = arith.constant 0 : index
      %59 = vector.load %arg3[%c0_17, %c0_18] : memref<8x128xf32, #tpu.memory_space<vmem>>, vector<8x128xf32>
      tpu.vector_store %arg3[%c0_17, %c0_18], %58 {strides = array<i32>} : memref<8x128xf32, #tpu.memory_space<vmem>>, vector<8x128xf32>,
    } else {
    }
    return
  }
  func.func @transform_0(%arg0: i32) -> (i32, i32, i32) {
    %c0_i32 = arith.constant 0 : i32
    %c0_i32_0 = arith.constant 0 : i32
    %c0_i32_1 = arith.constant 0 : i32
    return %c0_i32, %arg0, %c0_i32_0 : i32, i32, i32
  }
  func.func @transform_1(%arg0: i32) -> (i32, i32) {
    %c0_i32 = arith.constant 0 : i32
    %c0_i32_0 = arith.constant 0 : i32
    return %arg0, %c0_i32 : i32, i32
  }
  func.func @transform_2(%arg0: i32) -> (i32, i32) {
    %c0_i32 = arith.constant 0 : i32
    %c0_i32_0 = arith.constant 0 : i32
    return %arg0, %c0_i32 : i32, i32
  }
}

</mosaic_0001>

<bundles_post_ra>
// kernel: tpu_custom_call.1
= control target key start
LH: loop header
LB: loop body
LE: loop exit
PB: predicated region body
PF: predicated region fallthrough
CT: control target
= control target key end

     0   :  { %7 = vsyncpa [#allocation3], 0  ;;  %s467_s0 = inlined_call_operand.hbm [shape: f32[2,32,128], index: 0, kind: input, shape index: {}]   ;;  %s468_s1 = inlined_call_operand.hbm [shape: s8[32,128], index: 1, kind: input, shape index: {}]   ;;  %s469_s2 = inlined_call_operand.hbm [shape: f32[8,128], index: 2, kind: output, shape index: {}]  }
   0x1   :  { %8 = vsyncpa [#allocation6], 0 }
   0x2   :  { %9 = vsyncpa [#allocation4], 0  ;;  %s327_s9 = smov [#allocation2]   ;;  %s255_s13 = scalar_lea.hbm %s467_s0, 1024 }
   0x3   :  { %s15_s10 = sshll.u32 %s327_s9, 4  ;;  %p256_p0 = scmp.ne.s32.totalorder %s467_s0, %s255_s13  ;;  %s16_s10 = int_to_ptr.vmem [resolvable:$true] %s15_s10 }
   0x4   :  { %p259_p1 = scmp.lt.u32.totalorder %s255_s13, %s467_s0 }
   0x6   :  { %p261_p2 = pnand %p259_p1, %p256_p0 }
   0x8   :  { %264 = shalt.err (!%p261_p2)
}
   0x9   :  { %s265_s18 = scalar_lea.vmem %s16_s10, 1024  ;;  %p270_p4 = scmp.lt.s32.totalorder %s16_s10, %s16_s10 }
   0xa   :  { %p266_p3 = scmp.ne.s32.totalorder %s16_s10, %s265_s18  ;;  %p271_p5 = scmp.lt.s32.totalorder %s265_s18, %s265_s18 }
   0xc   :  { %p272_p6 = por %p271_p5, %p270_p4 }
   0xe   :  { %p273_p7 = pnand %p272_p6, %p266_p3 }
  0x10   :  { %276 = shalt.err (!%p273_p7)
}
  0x11   :  { %s328_s19 = smov 128   ;;  %s329_s20 = smov 8  }
  0x12   :  { %21 = dma.hbm_to_vmem [thread:$0]  %s467_s0, 1024, %s16_s10, [#allocation3], %s328_s19, %s328_s19, %s329_s20  }
  0x13   :  { %s330_s23 = smov [#allocation5]   ;;  %s277_s27 = scalar_lea.hbm %s468_s1, 128 }
  0x14   :  { %s28_s24 = sshll.u32 %s330_s23, 4  ;;  %p278_p8 = scmp.ne.s32.totalorder %s468_s1, %s277_s27  ;;  %s29_s24 = int_to_ptr.vmem [resolvable:$true] %s28_s24 }
  0x15   :  { %p281_p9 = scmp.lt.u32.totalorder %s277_s27, %s468_s1 }
  0x17   :  { %p283_p10 = pnand %p281_p9, %p278_p8 }
  0x19   :  { %286 = shalt.err (!%p283_p10)
}
  0x1a   :  { %s287_s4 = scalar_lea.vmem %s29_s24, 128  ;;  %p292_p12 = scmp.lt.s32.totalorder %s29_s24, %s29_s24 }
  0x1b   :  { %p288_p11 = scmp.ne.s32.totalorder %s29_s24, %s287_s4  ;;  %p293_p13 = scmp.lt.s32.totalorder %s287_s4, %s287_s4 }
  0x1d   :  { %p294_p0 = por %p293_p13, %p292_p12 }
  0x1f   :  { %p295_p1 = pnand %p294_p0, %p288_p11 }
  0x21   :  { %298 = shalt.err (!%p295_p1)
}
  0x22   :  { %31 = dma.hbm_to_vmem [thread:$0]  %s468_s1, 128, %s29_s24, [#allocation6]  }
  0x23   :  { %321 = dma.done.wait [#allocation3], 1024  }
  0x24   :  { %322 = vsyncadd [#allocation3], 4294966272 }
  0x25   :  { %323 = dma.done.wait [#allocation6], 128  }
  0x26   :  { %324 = vsyncadd [#allocation6], 4294967168  ;;  %v371_v0 = vld [vmem:[#allocation2] sm:$0xff]  ;;  %v373_v1 = vld [vmem:[#allocation2 + $0x8] sm:$0xff]  ;;  %s331_s1 = smov [#allocation7]  }
  0x27   :  { %v375_v2 = vld [vmem:[#allocation2 + $0x10] sm:$0xff]  ;;  %v377_v3 = vld [vmem:[#allocation2 + $0x18] sm:$0xff]  ;;  %v379_v4 = vld [vmem:[#allocation2 + $0x20] sm:$0xff]  ;;  %s216_s6 = sshll.u32 %s331_s1, 4  ;;  %s217_s6 = int_to_ptr.vmem [resolvable:$true] %s216_s6 }
  0x28   :  { %v381_v5 = vld [vmem:[#allocation2 + $0x28] sm:$0xff]  ;;  %v383_v6 = vld [vmem:[#allocation2 + $0x30] sm:$0xff]  ;;  %v385_v7 = vld [vmem:[#allocation2 + $0x38] sm:$0xff]  ;;  %v55_v8 = vsub.f32 %v371_v0, %v379_v4  ;;  %v95_v35 = vsub.f32 %v379_v4, %v371_v0  ;;  %v59_v51 = vmax.f32 %v371_v0, %v379_v4  ;;  %v115_v53 = vadd.f32 %v379_v4, %v371_v0  ;;  %s299_s7 = scalar_lea.vmem %s217_s6, 128  ;;  %p304_p3 = scmp.lt.s32.totalorder %s217_s6, %s217_s6 }
  0x29   :  { %v56_v9 = vsub.f32 %v373_v1, %v381_v5  ;;  %v57_v10 = vsub.f32 %v375_v2, %v383_v6  ;;  %v58_v11 = vsub.f32 %v377_v3, %v385_v7  ;;  %v46_v24 = vld [vmem:[#allocation5] sm:$0xff]  ;;  %v96_v39 = vsub.f32 %v381_v5, %v373_v1  ;;  %p300_p2 = scmp.ne.s32.totalorder %s217_s6, %s299_s7  ;;  %p305_p4 = scmp.lt.s32.totalorder %s299_s7, %s299_s7 }
  0x2a   :  { %v63_v12 = vand.u32 2147483647, %v55_v8  ;;  %v47_v25 = vunpack.c.0.s8 %v46_v24  ;;  %v48_v26 = vunpack.c.1.s8 %v46_v24  ;;  %v49_v28 = vunpack.c.2.s8 %v46_v24 }
  0x2b   :  { %v64_v13 = vand.u32 2147483647, %v56_v9  ;;  %v65_v14 = vand.u32 2147483647, %v57_v10  ;;  %v66_v15 = vand.u32 2147483647, %v58_v11  ;;  %v50_v30 = vunpack.c.3.s8 %v46_v24  ;;  %p306_p5 = por %p305_p4, %p304_p3 }
  0x2c   :  { %v67_v16 = vsub.f32 0.0, %v63_v12  ;;  %v395_v33 = vcvt.s32.f32 %v47_v25  ;;  %v399_v37 = vcvt.s32.f32 %v48_v26  ;;  %v403_v40 = vcvt.s32.f32 %v49_v28 }
  0x2d   :  { %v68_v17 = vsub.f32 0.0, %v64_v13  ;;  %v69_v18 = vsub.f32 0.0, %v65_v14  ;;  %v70_v19 = vsub.f32 0.0, %v66_v15  ;;  %v97_v42 = vsub.f32 %v383_v6, %v375_v2  ;;  %p307_p6 = pnand %p306_p5, %p300_p2 }
  0x2e   :  { %v71_v20 = vmul.f32 1.442695, %v67_v16  ;;  %v407_v43 = vcvt.s32.f32 %v50_v30  ;;  %v98_v44 = vsub.f32 %v385_v7, %v377_v3  ;;  %v99_v45 = vmul.f32 %v95_v35, %v395_v33 }
  0x2f   :  { %v73_v21 = vmul.f32 1.442695, %v68_v17  ;;  %v75_v22 = vmul.f32 1.442695, %v69_v18  ;;  %v77_v23 = vmul.f32 1.442695, %v70_v19  ;;  %v100_v46 = vmul.f32 %v96_v39, %v399_v37 }
  0x30   :  { %231 = vpow2.f32 %v71_v20  ;;  %v101_v47 = vmul.f32 %v97_v42, %v403_v40  ;;  %v102_v48 = vmul.f32 %v98_v44, %v407_v43  ;;  %v103_v49 = vadd.f32 %v99_v45, %v371_v0 }
  0x31   :  { %233 = vpow2.f32 %v73_v21  ;;  %v104_v50 = vadd.f32 %v100_v46, %v373_v1  ;;  %v60_v55 = vmax.f32 %v373_v1, %v381_v5  ;;  %v116_v57 = vadd.f32 %v381_v5, %v373_v1 }
  0x32   :  { %235 = vpow2.f32 %v75_v22  ;;  %v105_v52 = vadd.f32 %v101_v47, %v375_v2  ;;  %v106_v56 = vadd.f32 %v102_v48, %v377_v3  ;;  %v61_v59 = vmax.f32 %v375_v2, %v383_v6 }
  0x33   :  { %237 = vpow2.f32 %v77_v23  ;;  %v107_v61 = vmul.f32 0.9, %v103_v49  ;;  %v117_v62 = vadd.f32 %v383_v6, %v375_v2  ;;  %v62_v0 = vmax.f32 %v377_v3, %v385_v7 }
  0x34   :  { %v108_v8 = vmul.f32 0.9, %v104_v50  ;;  %v118_v9 = vadd.f32 %v385_v7, %v377_v3  ;;  %v109_v11 = vmul.f32 0.9, %v105_v52  ;;  %v119_v12 = vmul.f32 0.05, %v115_v53 }
  0x35   :  { %v110_v15 = vmul.f32 0.9, %v106_v56  ;;  %v120_v16 = vmul.f32 0.05, %v116_v57  ;;  %v121_v6 = vmul.f32 0.05, %v117_v62 }
  0x36   :  { %v122_v20 = vmul.f32 0.05, %v118_v9  ;;  %v155_v44 = vmul.f32 0.6, %v395_v33  ;;  %v156_v48 = vmul.f32 0.6, %v399_v37 }
  0x38   :  { %v160_v37 = vadd.f32 0.2, %v156_v48 }
  0x3a   :  { %v232_v27 = vpop.eup %231 }
  0x3b   :  { %v234_v29 = vpop.eup %233  ;;  %v79_v31 = vadd.f32 1.0, %v232_v27 }
  0x3c   :  { %v236_v32 = vpop.eup %235  ;;  %v80_v34 = vadd.f32 1.0, %v234_v29 }
  0x3d   :  { %v238_v36 = vpop.eup %237  ;;  %v81_v38 = vadd.f32 1.0, %v236_v32  ;;  %239 = vlog2.f32 %v79_v31 }
  0x3e   :  { %v82_v41 = vadd.f32 1.0, %v238_v36  ;;  %241 = vlog2.f32 %v80_v34  ;;  %v183_v34 = vlaneseq }
  0x3f   :  { %243 = vlog2.f32 %v81_v38 }
  0x40   :  { %245 = vlog2.f32 %v82_v41  ;;  %v184_v35 = vshrl.u32 %v183_v34, 7  ;;  %v189_v49 = vand.u32 127, %v183_v34 }
  0x42   :  { %v185_v36 = vadd.s32 8, %v184_v35  ;;  %v186_v39 = vadd.s32 16, %v184_v35  ;;  %v187_v45 = vadd.s32 24, %v184_v35  ;;  %v190_v50 = vmul.u32 128, %v184_v35 }
  0x44   :  { %v193_v62 = vmul.u32 128, %v187_v45 }
  0x47   :  { %v240_v54 = vpop.eup %239 }
  0x48   :  { %v242_v58 = vpop.eup %241  ;;  %v84_v60 = vmul.f32 0.6931472, %v240_v54  ;;  %v157_v54 = vmul.f32 0.6, %v403_v40 }
  0x49   :  { %v244_v63 = vpop.eup %243  ;;  %v86_v4 = vmul.f32 0.6931472, %v242_v58  ;;  %v158_v58 = vmul.f32 0.6, %v407_v43  ;;  %v197_v43 = vadd.s32 %v193_v62, %v189_v49 }
  0x4a   :  { %v246_v10 = vpop.eup %245  ;;  %v88_v1 = vmul.f32 0.6931472, %v244_v63  ;;  %v91_v5 = vadd.f32 %v84_v60, %v59_v51 }
  0x4b   :  { %v90_v13 = vmul.f32 0.6931472, %v246_v10  ;;  %v92_v14 = vadd.f32 %v86_v4, %v60_v55  ;;  %v191_v55 = vmul.u32 128, %v185_v36  ;;  %v194_v4 = vadd.s32 %v190_v50, %v189_v49 }
  0x4c   :  { %v93_v17 = vadd.f32 %v88_v1, %v61_v59  ;;  %v111_v2 = vsub.f32 %v91_v5, %v107_v61  ;;  %v192_v59 = vmul.u32 128, %v186_v39  ;;  %v159_v61 = vadd.f32 0.2, %v155_v44 }
  0x4d   :  { %v94_v18 = vadd.f32 %v90_v13, %v62_v0  ;;  %v112_v19 = vsub.f32 %v92_v14, %v108_v8  ;;  %v161_v10 = vadd.f32 0.2, %v157_v54  ;;  %v195_v1 = vadd.s32 %v191_v55, %v189_v49 }
  0x4e   :  { %v113_v21 = vsub.f32 %v93_v17, %v109_v11  ;;  %v435_v22 = vsub.f32 %v111_v2, %v119_v12  ;;  %v162_v11 = vadd.f32 0.2, %v158_v58  ;;  %v196_v12 = vadd.s32 %v192_v59, %v189_v49 }
  0x4f   :  { %v114_v23 = vsub.f32 %v94_v18, %v110_v15  ;;  %v437_v3 = vsub.f32 %v112_v19, %v120_v16  ;;  %vm198_vm0 = vcmp.lt.s32.totalorder %v194_v4, 1000  ;;  %vm199_vm1 = vcmp.lt.s32.totalorder %v195_v1, 1000 }
  0x50   :  { %v439_v7 = vsub.f32 %v113_v21, %v121_v6  ;;  %v127_v24 = vsub.f32 0.0, %v435_v22  ;;  %vm200_vm2 = vcmp.lt.s32.totalorder %v196_v12, 1000  ;;  %vm201_vm3 = vcmp.lt.s32.totalorder %v197_v43, 1000 }
  0x51   :  { %v442_v25 = vsub.f32 %v114_v23, %v122_v20  ;;  %v128_v26 = vsub.f32 0.0, %v437_v3 }
  0x52   :  { %v129_v27 = vsub.f32 0.0, %v439_v7  ;;  %v131_v28 = vmul.f32 1.442695, %v127_v24 }
  0x53   :  { %v130_v29 = vsub.f32 0.0, %v442_v25  ;;  %v133_v30 = vmul.f32 1.442695, %v128_v26 }
  0x54   :  { %247 = vpow2.f32 %v131_v28  ;;  %v135_v31 = vmul.f32 1.442695, %v129_v27 }
  0x55   :  { %249 = vpow2.f32 %v133_v30  ;;  %v137_v32 = vmul.f32 1.442695, %v130_v29 }
  0x56   :  { %251 = vpow2.f32 %v135_v31 }
  0x57   :  { %253 = vpow2.f32 %v137_v32 }
  0x5e   :  { %v248_v38 = vpop.eup %247 }
  0x5f   :  { %v250_v41 = vpop.eup %249  ;;  %v139_v42 = vsub.f32 1.0, %v248_v38 }
  0x60   :  { %v252_v46 = vpop.eup %251  ;;  %v140_v47 = vsub.f32 1.0, %v250_v41 }
  0x61   :  { %v254_v51 = vpop.eup %253  ;;  %v141_v52 = vsub.f32 1.0, %v252_v46  ;;  %v143_v53 = vmax.f32 %v139_v42, 0.0 }
  0x62   :  { %v142_v56 = vsub.f32 1.0, %v254_v51  ;;  %v144_v57 = vmax.f32 %v140_v47, 0.0 }
  0x63   :  { %v145_v60 = vmax.f32 %v141_v52, 0.0  ;;  %v147_v33 = vmul.f32 %v143_v53, %v143_v53 }
  0x64   :  { %v146_v63 = vmax.f32 %v142_v56, 0.0  ;;  %v148_v0 = vmul.f32 %v144_v57, %v144_v57 }
  0x65   :  { %v149_v8 = vmul.f32 %v145_v60, %v145_v60  ;;  %v151_v9 = vmul.f32 %v147_v33, %v143_v53 }
  0x66   :  { %v150_v5 = vmul.f32 %v146_v63, %v146_v63  ;;  %v152_v40 = vmul.f32 %v148_v0, %v144_v57 }
  0x67   :  { %v153_v13 = vmul.f32 %v149_v8, %v145_v60  ;;  %v163_v14 = vmul.f32 %v159_v61, %v151_v9 }
  0x68   :  { %v154_v15 = vmul.f32 %v150_v5, %v146_v63  ;;  %v164_v16 = vmul.f32 %v160_v37, %v152_v40 }
  0x69   :  { %v165_v17 = vmul.f32 %v161_v10, %v153_v13  ;;  %v167_v2 = vmul.f32 %v163_v14, %v435_v22 }
  0x6a   :  { %v166_v6 = vmul.f32 %v162_v11, %v154_v15  ;;  %v168_v18 = vmul.f32 %v164_v16, %v437_v3 }
  0x6b   :  { %v169_v19 = vmul.f32 %v165_v17, %v439_v7  ;;  %v202_v20 = vsel %vm198_vm0, %v167_v2, 0.0 }
  0x6c   :  { %v170_v21 = vmul.f32 %v166_v6, %v442_v25  ;;  %v203_v23 = vsel %vm199_vm1, %v168_v18, 0.0 }
  0x6d   :  { %v204_v24 = vsel %vm200_vm2, %v169_v19, 0.0  ;;  %v206_v26 = vadd.f32 %v203_v23, %v202_v20 }
  0x6e   :  { %v205_v27 = vsel %vm201_vm3, %v170_v21, 0.0 }
  0x6f   :  { %v207_v28 = vadd.f32 %v206_v26, %v204_v24 }
  0x71   :  { %v208_v29 = vadd.f32 %v207_v28, %v205_v27 }
  0x73   :  { %209 = vst [vmem:[#allocation7] sm:$0xff] %v208_v29 }
  0x74   :  { %310 = shalt.err (!%p307_p6)
}
  0x75   :  { %s311_s10 = scalar_lea.hbm %s469_s2, 128 }
  0x76   :  { %p312_p7 = scmp.ne.s32.totalorder %s469_s2, %s311_s10  ;;  %p315_p8 = scmp.lt.u32.totalorder %s311_s10, %s469_s2 }
  0x78   :  { %p317_p9 = pnand %p315_p8, %p312_p7 }
  0x7a   :  { %320 = shalt.err (!%p317_p9)
}
  0x7b   :  { %219 = dma.vmem_to_hbm [thread:$0]  %s217_s6, 128, %s469_s2, [#allocation4]  }
  0x7c   :  { %325 = dma.done.wait [#allocation4], 128  }
  0x7d   :  { %326 = vsyncadd [#allocation4], 4294967168 }
  0x7e   :  { %223 = vsyncpa [#allocation3], 1 }
  0x7f   :  { %224 = vsyncpa [#allocation6], 1 }
  0x80   :  { %225 = vsyncpa [#allocation4], 1 }

</bundles_post_ra>
